<compile_context>
chip_gen: v7x
topology: tpu7x:2x2x1
jax: 0.10.0
libtpu: 0.0.40
codegen_flags: <defaults>
</compile_context>

<pallas_src>
import jax
import jax.numpy as jnp
from jax import lax
from jax.experimental import pallas as pl
from jax.experimental.pallas import tpu as pltpu

SELU_ALPHA = 1.6732632423543772
SELU_SCALE = 1.0507009873554805
BN_EPS = 1e-3            # nn.BatchNorm1d(..., eps=0.001)
DEFAULT_TILE_B = 32768   # multiple of 128; sweep 8192..32768 (f32) per chip


def _selu(x):
    # SELU: scale * (x if x > 0 else alpha * (exp(x) - 1))
    return SELU_SCALE * jnp.where(x > 0, x, SELU_ALPHA * (jnp.exp(x) - 1.0))


def _round_up(x, m):
    return ((x + m - 1) // m) * m


def _encoder_kernel(x_ref, w1_ref, b1_ref, w2_ref, b2_ref, w3_ref, b3_ref,
                    out_ref):
    # x_ref : (TILE_B, F) input tile in its natural row-major HBM layout/dtype.
    # wk_ref: (out_k, in_k) feature-major weights (BN folded into w1/b1).
    # bk_ref: (out_k, 1) f32 biases (broadcast along the 128-lane batch axis).
    # out_ref: (n_coeff, TILE_B) -- batch on the lane axis (dense stores).
    x = x_ref[...].astype(w1_ref.dtype)   # in-kernel cast: no extra HBM pass

    # Layer 1: h[o, b] = sum_f w1[o, f] * x[b, f] -- NT contraction on the MXU;
    # this also flips the big tile into (features, batch) orientation for free.
    h = lax.dot_general(w1_ref[...], x, (((1,), (1,)), ((), ())),
                        preferred_element_type=jnp.float32)
    h = _selu(h + b1_ref[...])                                   # (H, TILE_B) f32

    h = jnp.dot(w2_ref[...], h.astype(w2_ref.dtype),
                preferred_element_type=jnp.float32)
    h = _selu(h + b2_ref[...])                                   # (H, TILE_B) f32

    o = jnp.dot(w3_ref[...], h.astype(w3_ref.dtype),
                preferred_element_type=jnp.float32)
    o = _selu(o + b3_ref[...])                                   # (C, TILE_B) f32

    out_ref[...] = o.astype(out_ref.dtype)


def neural_rti_encoder(ray, params, *, tile_b=DEFAULT_TILE_B,
                       mxu_dtype=jnp.bfloat16, layer1_f32=False,
                       out_dtype=jnp.float32, transpose_output=True):
    """Forward pass. ray: (B, 3*n_lights) -> (B, n_coeff) (or (n_coeff, B)).

    BatchNorm1d uses batch statistics (PyTorch training-mode / fresh-module
    semantics). Stats are computed over the FULL batch with one fused XLA
    reduction pass and folded into the first Linear, so the kernel's batch
    tiles are independent ("parallel" grid axis, both v7x TCs usable).
    """
    ray = jnp.asarray(ray)
    B, F = ray.shape
    n_coeff = params["w3"].shape[1]

    # ---- BatchNorm stats: single pass (mean & E[x^2]), folded into Linear 1.
    x32 = ray.astype(jnp.float32)
    m1 = jnp.mean(x32, axis=0)
    m2 = jnp.mean(jnp.square(x32), axis=0)
    var = jnp.maximum(m2 - jnp.square(m1), 0.0)          # biased variance
    s = params["gamma"] * lax.rsqrt(var + BN_EPS)        # (F,)
    t = params["beta"] - m1 * s                          # (F,)

    w1_dtype = jnp.float32 if layer1_f32 else mxu_dtype
    w1k = (params["w1"] * s[:, None]).T.astype(w1_dtype)               # (H, F)
    b1k = (t @ params["w1"] + params["b1"]).astype(jnp.float32)[:, None]
    w2k = params["w2"].T.astype(mxu_dtype)                             # (H, H)
    b2k = params["b2"].astype(jnp.float32)[:, None]
    w3k = params["w3"].T.astype(mxu_dtype)                             # (C, H)
    b3k = params["b3"].astype(jnp.float32)[:, None]

    # ---- Batch tiling: tile_b multiple of 128 (lane-dense output stores).
    #      No padding of the input: the last (possibly partial) grid block is
    #      handled by Pallas ragged-edge reads / masked edge writes.
    b128 = _round_up(B, 128)
    tile_b = _round_up(max(128, min(int(tile_b), b128)), 128)
    if pl.cdiv(b128, tile_b) < 2 and b128 >= 256:
        # Keep >=2 grid steps so v7x can split work across its 2 TensorCores.
        tile_b = _round_up(pl.cdiv(b128, 2), 128)
    grid = (pl.cdiv(B, tile_b),)

    const2d = lambda i: (0, 0)   # params stay VMEM-resident (no per-step re-DMA)
    out_t = pl.pallas_call(
        _encoder_kernel,
        out_shape=jax.ShapeDtypeStruct((n_coeff, B), out_dtype),
        grid=grid,
        in_specs=[
            pl.BlockSpec((tile_b, F), lambda i: (i, 0)),   # streamed input tile
            pl.BlockSpec(w1k.shape, const2d),
            pl.BlockSpec(b1k.shape, const2d),
            pl.BlockSpec(w2k.shape, const2d),
            pl.BlockSpec(b2k.shape, const2d),
            pl.BlockSpec(w3k.shape, const2d),
            pl.BlockSpec(b3k.shape, const2d),
        ],
        out_specs=pl.BlockSpec((n_coeff, tile_b), lambda i: (0, i)),
        compiler_params=pltpu.CompilerParams(
            dimension_semantics=("parallel",)),
    )(ray, w1k, b1k, w2k, b2k, w3k, b3k)

    # Module layout is (B, n_coeff); pass transpose_output=False to keep the
    # lane-major (n_coeff, B) layout and skip this extra HBM pass.
    return out_t.T if transpose_output else out_t


def init_params(key, n_coeff, n_lights):
    n_units = 3 * n_lights
    ks = jax.random.split(key, 6)

    def linear(kw, kb, fan_in, fan_out):
        bound = 1.0 / jnp.sqrt(float(fan_in))
        w = jax.random.uniform(kw, (fan_in, fan_out), jnp.float32, -bound, bound)
        b = jax.random.uniform(kb, (fan_out,), jnp.float32, -bound, bound)
        return w, b

    w1, b1 = linear(ks[0], ks[1], n_units, n_units)
    w2, b2 = linear(ks[2], ks[3], n_units, n_units)
    w3, b3 = linear(ks[4], ks[5], n_units, n_coeff)
    return {
        "gamma": jnp.ones((n_units,), jnp.float32),   # BN weight
        "beta": jnp.zeros((n_units,), jnp.float32),   # BN bias
        "w1": w1, "b1": b1, "w2": w2, "b2": b2, "w3": w3, "b3": b3,
    }


def reference_forward(ray, params):
    # Pure-JAX row-major reference (matches the PyTorch module's forward,
    # training-mode BatchNorm with biased batch variance).
    mean = jnp.mean(ray, axis=0)
    var = jnp.mean(jnp.square(ray - mean), axis=0)
    xn = (ray - mean) * lax.rsqrt(var + BN_EPS)
    xn = xn * params["gamma"] + params["beta"]
    h = _selu(xn @ params["w1"] + params["b1"])
    h = _selu(h @ params["w2"] + params["b2"])
    return _selu(h @ params["w3"] + params["b3"])


if __name__ == "__main__":
    n_lights = 8               # -> n_units = 24
    n_coeff = 9
    batch = 1000               # not a tile multiple -> exercises ragged-edge path

    key = jax.random.PRNGKey(0)
    k_x, k_p = jax.random.split(key)
    ray = jax.random.normal(k_x, (batch, 3 * n_lights), jnp.float32)
    params = init_params(k_p, n_coeff, n_lights)

    ref = reference_forward(ray, params)

    # Full-f32 MXU path, small tile -> several grid steps; tight tolerance.
    out_f32 = neural_rti_encoder(ray, params, tile_b=256, mxu_dtype=jnp.float32)
    out_f32 = jax.block_until_ready(out_f32)
    assert out_f32.shape == (batch, n_coeff)
    assert bool(jnp.allclose(out_f32, ref, atol=1e-3, rtol=1e-3)), \
        float(jnp.max(jnp.abs(out_f32 - ref)))

    # Default path: bf16 weights + in-kernel input cast, auto tile (clamped to
    # the batch and split into >=2 grid steps); bf16 tolerance.
    out_bf = neural_rti_encoder(ray, params)
    out_bf = jax.block_until_ready(out_bf)
    assert out_bf.shape == (batch, n_coeff)
    assert bool(jnp.allclose(out_bf, ref, atol=2e-1, rtol=1e-1))

    # Mixed precision: layer 1 (folded BN on raw input) in f32, layers 2/3 bf16.
    out_mix = neural_rti_encoder(ray, params, tile_b=512, layer1_f32=True)
    out_mix = jax.block_until_ready(out_mix)
    assert out_mix.shape == (batch, n_coeff)
    assert bool(jnp.allclose(out_mix, ref, atol=2e-1, rtol=1e-1))

    # Lane-major output layout (skips the final transpose HBM pass).
    out_lm = neural_rti_encoder(ray, params, mxu_dtype=jnp.float32,
                                transpose_output=False)
    out_lm = jax.block_until_ready(out_lm)
    assert out_lm.shape == (n_coeff, batch)
    assert bool(jnp.allclose(out_lm.T, ref, atol=1e-3, rtol=1e-3))

    print("KERNEL_OK")
</pallas_src>

<mosaic_0001>
module attributes {stable_mosaic.version = 11 : i64} {
  func.func @_encoder_kernel(%arg0: i32, %arg1: memref<256x24xf32, #tpu.memory_space<vmem>>, %arg2: memref<24x24xf32, #tpu.memory_space<vmem>>, %arg3: memref<24x1xf32, #tpu.memory_space<vmem>>, %arg4: memref<24x24xf32, #tpu.memory_space<vmem>>, %arg5: memref<24x1xf32, #tpu.memory_space<vmem>>, %arg6: memref<9x24xf32, #tpu.memory_space<vmem>>, %arg7: memref<9x1xf32, #tpu.memory_space<vmem>>, %arg8: memref<9x256xf32, #tpu.memory_space<vmem>>) attributes {dimension_semantics = [#tpu.dimension_semantics<parallel>], iteration_bounds = array<i64: 4>, scalar_prefetch = 0 : i64, scratch_operands = 0 : i64, tpu.core_type = #tpu.core_type<tc>, window_params = [{transform_indices = @transform_0, window_bounds = array<i64: 256, 24>}, {pipeline_mode = #tpu.pipeline_mode<synchronous>, transform_indices = @transform_1, window_bounds = array<i64: 24, 24>}, {pipeline_mode = #tpu.pipeline_mode<synchronous>, transform_indices = @transform_2, window_bounds = array<i64: 24, 1>}, {pipeline_mode = #tpu.pipeline_mode<synchronous>, transform_indices = @transform_3, window_bounds = array<i64: 24, 24>}, {pipeline_mode = #tpu.pipeline_mode<synchronous>, transform_indices = @transform_4, window_bounds = array<i64: 24, 1>}, {pipeline_mode = #tpu.pipeline_mode<synchronous>, transform_indices = @transform_5, window_bounds = array<i64: 9, 24>}, {pipeline_mode = #tpu.pipeline_mode<synchronous>, transform_indices = @transform_6, window_bounds = array<i64: 9, 1>}, {transform_indices = @transform_7, window_bounds = array<i64: 9, 256>}]} {
    %c0 = arith.constant 0 : index
    %c0_0 = arith.constant 0 : index
    %0 = vector.load %arg1[%c0, %c0_0] : memref<256x24xf32, #tpu.memory_space<vmem>>, vector<256x24xf32>
    %c0_1 = arith.constant 0 : index
    %c0_2 = arith.constant 0 : index
    %1 = vector.load %arg2[%c0_1, %c0_2] : memref<24x24xf32, #tpu.memory_space<vmem>>, vector<24x24xf32>
    %cst = arith.constant dense<0.000000e+00> : vector<24x256xf32>
    %2 = tpu.matmul %1, %0, %cst {dimension_numbers = #tpu.dot_dimension_numbers<[1], [1], [0], [0], [0, 0, 1, 0], [], []>} : vector<24x24xf32>, vector<256x24xf32>, vector<24x256xf32> -> vector<24x256xf32>
    %c0_3 = arith.constant 0 : index
    %c0_4 = arith.constant 0 : index
    %3 = vector.load %arg3[%c0_3, %c0_4] : memref<24x1xf32, #tpu.memory_space<vmem>>, vector<24x1xf32>
    %4 = vector.broadcast %3 : vector<24x1xf32> to vector<24x256xf32>
    %5 = arith.addf %2, %4 : vector<24x256xf32>
    %cst_5 = arith.constant 0.000000e+00 : f32
    %6 = vector.broadcast %cst_5 : f32 to vector<24x256xf32>
    %7 = arith.cmpf ogt, %5, %6 : vector<24x256xf32>
    %8 = math.exp %5 : vector<24x256xf32>
    %cst_6 = arith.constant 1.000000e+00 : f32
    %9 = vector.broadcast %cst_6 : f32 to vector<24x256xf32>
    %10 = arith.subf %8, %9 : vector<24x256xf32>
    %cst_7 = arith.constant 1.67326319 : f32
    %11 = vector.broadcast %cst_7 : f32 to vector<24x256xf32>
    %12 = arith.mulf %11, %10 : vector<24x256xf32>
    %13 = arith.select %7, %5, %12 : vector<24x256xi1>, vector<24x256xf32>
    %cst_8 = arith.constant 1.05070102 : f32
    %14 = vector.broadcast %cst_8 : f32 to vector<24x256xf32>
    %15 = arith.mulf %14, %13 : vector<24x256xf32>
    %c0_9 = arith.constant 0 : index
    %c0_10 = arith.constant 0 : index
    %16 = vector.load %arg4[%c0_9, %c0_10] : memref<24x24xf32, #tpu.memory_space<vmem>>, vector<24x24xf32>
    %cst_11 = arith.constant dense<0.000000e+00> : vector<24x256xf32>
    %17 = tpu.matmul %16, %15, %cst_11 {dimension_numbers = #tpu.dot_dimension_numbers<[1], [0], [0], [1], [0, 0, 1, 1], [], []>} : vector<24x24xf32>, vector<24x256xf32>, vector<24x256xf32> -> vector<24x256xf32>
    %c0_12 = arith.constant 0 : index
    %c0_13 = arith.constant 0 : index
    %18 = vector.load %arg5[%c0_12, %c0_13] : memref<24x1xf32, #tpu.memory_space<vmem>>, vector<24x1xf32>
    %19 = vector.broadcast %18 : vector<24x1xf32> to vector<24x256xf32>
    %20 = arith.addf %17, %19 : vector<24x256xf32>
    %cst_14 = arith.constant 0.000000e+00 : f32
    %21 = vector.broadcast %cst_14 : f32 to vector<24x256xf32>
    %22 = arith.cmpf ogt, %20, %21 : vector<24x256xf32>
    %23 = math.exp %20 : vector<24x256xf32>
    %cst_15 = arith.constant 1.000000e+00 : f32
    %24 = vector.broadcast %cst_15 : f32 to vector<24x256xf32>
    %25 = arith.subf %23, %24 : vector<24x256xf32>
    %cst_16 = arith.constant 1.67326319 : f32
    %26 = vector.broadcast %cst_16 : f32 to vector<24x256xf32>
    %27 = arith.mulf %26, %25 : vector<24x256xf32>
    %28 = arith.select %22, %20, %27 : vector<24x256xi1>, vector<24x256xf32>
    %cst_17 = arith.constant 1.05070102 : f32
    %29 = vector.broadcast %cst_17 : f32 to vector<24x256xf32>
    %30 = arith.mulf %29, %28 : vector<24x256xf32>
    %c0_18 = arith.constant 0 : index
    %c0_19 = arith.constant 0 : index
    %31 = vector.load %arg6[%c0_18, %c0_19] : memref<9x24xf32, #tpu.memory_space<vmem>>, vector<9x24xf32>
    %cst_20 = arith.constant dense<0.000000e+00> : vector<9x256xf32>
    %32 = tpu.matmul %31, %30, %cst_20 {dimension_numbers = #tpu.dot_dimension_numbers<[1], [0], [0], [1], [0, 0, 1, 1], [], []>} : vector<9x24xf32>, vector<24x256xf32>, vector<9x256xf32> -> vector<9x256xf32>
    %c0_21 = arith.constant 0 : index
    %c0_22 = arith.constant 0 : index
    %33 = vector.load %arg7[%c0_21, %c0_22] : memref<9x1xf32, #tpu.memory_space<vmem>>, vector<9x1xf32>
    %34 = vector.broadcast %33 : vector<9x1xf32> to vector<9x256xf32>
    %35 = arith.addf %32, %34 : vector<9x256xf32>
    %cst_23 = arith.constant 0.000000e+00 : f32
    %36 = vector.broadcast %cst_23 : f32 to vector<9x256xf32>
    %37 = arith.cmpf ogt, %35, %36 : vector<9x256xf32>
    %38 = math.exp %35 : vector<9x256xf32>
    %cst_24 = arith.constant 1.000000e+00 : f32
    %39 = vector.broadcast %cst_24 : f32 to vector<9x256xf32>
    %40 = arith.subf %38, %39 : vector<9x256xf32>
    %cst_25 = arith.constant 1.67326319 : f32
    %41 = vector.broadcast %cst_25 : f32 to vector<9x256xf32>
    %42 = arith.mulf %41, %40 : vector<9x256xf32>
    %43 = arith.select %37, %35, %42 : vector<9x256xi1>, vector<9x256xf32>
    %cst_26 = arith.constant 1.05070102 : f32
    %44 = vector.broadcast %cst_26 : f32 to vector<9x256xf32>
    %45 = arith.mulf %44, %43 : vector<9x256xf32>
    %c0_27 = arith.constant 0 : index
    %c0_28 = arith.constant 0 : index
    %46 = vector.load %arg8[%c0_27, %c0_28] : memref<9x256xf32, #tpu.memory_space<vmem>>, vector<9x256xf32>
    tpu.vector_store %arg8[%c0_27, %c0_28], %45 {strides = array<i32>} : memref<9x256xf32, #tpu.memory_space<vmem>>, vector<9x256xf32>,
    return
  }
  func.func @transform_0(%arg0: i32) -> (i32, i32) {
    %c0_i32 = arith.constant 0 : i32
    %c0_i32_0 = arith.constant 0 : i32
    return %arg0, %c0_i32 : i32, i32
  }
  func.func @transform_1(%arg0: i32) -> (i32, i32) {
    %c0_i32 = arith.constant 0 : i32
    %c0_i32_0 = arith.constant 0 : i32
    %c0_i32_1 = arith.constant 0 : i32
    return %c0_i32, %c0_i32_0 : i32, i32
  }
  func.func @transform_2(%arg0: i32) -> (i32, i32) {
    %c0_i32 = arith.constant 0 : i32
    %c0_i32_0 = arith.constant 0 : i32
    %c0_i32_1 = arith.constant 0 : i32
    return %c0_i32, %c0_i32_0 : i32, i32
  }
  func.func @transform_3(%arg0: i32) -> (i32, i32) {
    %c0_i32 = arith.constant 0 : i32
    %c0_i32_0 = arith.constant 0 : i32
    %c0_i32_1 = arith.constant 0 : i32
    return %c0_i32, %c0_i32_0 : i32, i32
  }
  func.func @transform_4(%arg0: i32) -> (i32, i32) {
    %c0_i32 = arith.constant 0 : i32
    %c0_i32_0 = arith.constant 0 : i32
    %c0_i32_1 = arith.constant 0 : i32
    return %c0_i32, %c0_i32_0 : i32, i32
  }
  func.func @transform_5(%arg0: i32) -> (i32, i32) {
    %c0_i32 = arith.constant 0 : i32
    %c0_i32_0 = arith.constant 0 : i32
    %c0_i32_1 = arith.constant 0 : i32
    return %c0_i32, %c0_i32_0 : i32, i32
  }
  func.func @transform_6(%arg0: i32) -> (i32, i32) {
    %c0_i32 = arith.constant 0 : i32
    %c0_i32_0 = arith.constant 0 : i32
    %c0_i32_1 = arith.constant 0 : i32
    return %c0_i32, %c0_i32_0 : i32, i32
  }
  func.func @transform_7(%arg0: i32) -> (i32, i32) {
    %c0_i32 = arith.constant 0 : i32
    %c0_i32_0 = arith.constant 0 : i32
    return %c0_i32, %arg0 : i32, i32
  }
}

</mosaic_0001>

<bundles_post_ra>
// kernel: tpu_custom_call.1
= control target key start
LH: loop header
LB: loop body
LE: loop exit
PB: predicated region body
PF: predicated region fallthrough
CT: control target
= control target key end

     0   :  { %12 = vsyncpa [#allocation3], 0  ;;  %s1541_s0 = inlined_call_operand.vmem [shape: f32[1000,24], index: 0, kind: input, shape index: {}]   ;;  %s1542_s1 = inlined_call_operand.vmem [shape: f32[24,24], index: 1, kind: input, shape index: {}]   ;;  %s1543_s2 = inlined_call_operand.vmem [shape: f32[24,1], index: 2, kind: input, shape index: {}]   ;;  %s1544_s3 = inlined_call_operand.vmem [shape: f32[24,24], index: 3, kind: input, shape index: {}]   ;;  %s1545_s4 = inlined_call_operand.vmem [shape: f32[24,1], index: 4, kind: input, shape index: {}]   ;;  %s1546_s5 = inlined_call_operand.vmem [shape: f32[9,24], index: 5, kind: input, shape index: {}]   ;;  %s1547_s6 = inlined_call_operand.vmem [shape: f32[9,1], index: 6, kind: input, shape index: {}]   ;;  %s1548_s7 = inlined_call_operand.hbm [shape: f32[9,1000], index: 7, kind: output, shape index: {}]  }
   0x1   :  { %14 = vsyncpa [#allocation3 + $0x1], 0  ;;  %s1295_s24 = smov 0   ;;  %s1297_s25 = smov 0  }
   0x2   :  { %s1299_s26 = smov 0   ;;  %s1301_s27 = smov 0  }
   0x3 LB: > { %s1316_s28 = sadd.s32 4294967295, %s1247_s27   ;;  %s944_s29 = sadd.s32 4294967294, %s1247_s27   ;;  %s1247_s27 = sphi %s1301_s27, %s1556_s27   ;;  %s1243_s26 = sphi %s1299_s26, %s1555_s26   ;;  %s1239_s25 = sphi %s1297_s25, %s1554_s25   ;;  %s1235_s24 = sphi %s1295_s24, %s1553_s24  }
   0x4   : > { %s1320_s30 = sadd.s32 1, %s1247_s27   ;;  %s179_s8 = sadd.s32 1, %s1243_s26 }
   0x5   : > { %s176_s9 = ssub.s32 %s1247_s27, %s1320_s30  ;;  %p189_p0 = scmp.ne.s32.totalorder %s1243_s26, %s1239_s25 }
   0x6   : > { %p177_p1 = scmp.eq.s32.totalorder %s176_s9, 0  ;;  %p190_p2 = scmp.eq.s32.totalorder %s1316_s28, 3 }
   0x7   : > { %p195_p3 = scmp.ne.s32.totalorder %s1239_s25, %s1235_s24  ;;  %p196_p4 = scmp.eq.s32.totalorder %s944_s29, 3 }
   0x8   : > { %s1331_s10 = scalar_select %p177_p1, %s1243_s26, %s179_s8  }
   0x9   : > { %p1333_p5 = por %p190_p2, %p189_p0  ;;  %p1337_p6 = por %p196_p4, %p195_p3 }
   0xa   : > { %p947_p7 = scmp.ge.s32.totalorder %s1247_s27, 1  ;;  %p249_p8 = scmp.lt.s32.totalorder %s1247_s27, 5 }
   0xc   : > { %p250_p9 = pnand %p947_p7, %p249_p8 }
   0xd   : > { %s949_s13 = sshll.u32 (!%p250_p9), %s1316_s28, 5  ;;  %vm353_vm0 = vcmask (!%p250_p9), 195584   ;;  %v1347_v0 = vld [vmem:[%s1542_s1] sm:$0xff] (!%p250_p9)  ;;  %v1249_v1 = vmov (!%p250_p9), 0   ;;  %v337_v3 = vld [vmem:[%s1543_s2 + $0x10] sm:$0xff] (!%p250_p9)  ;;  %v336_v4 = vld [vmem:[%s1543_s2 + $0x8] sm:$0xff] (!%p250_p9) }
   0xe   : > { %253 = sbr.rel (%p250_p9) target bundleno = 840 (0x348), region = 48  ;;  %p290_p10 = scmp.lt.s32.totalorder (!%p250_p9), %s949_s13, 124  ;;  %1045 = vmatprep.mubr.msk.f32.mxu0 (!%p250_p9), %vm353_vm0, %v1347_v0  ;;  %1151 = vset.pattern.permute.xlu0 (!%p250_p9), %v1249_v1  ;;  %v335_v2 = vld [vmem:[%s1543_s2] sm:$0xff] (!%p250_p9)  ;;  %vm1370_vm1 = vmpackc.low (!%p250_p9), %vm353_vm0, %vm353_vm0  ;;  %v588_v7 = vld [vmem:[%s1545_s4 + $0x8] sm:$0xff] (!%p250_p9)  ;;  %v1250_v61 = vmov (!%p250_p9), 0.0  }
   0xf   : > { %340 = vperm.xlu0 (!%p250_p9), %1151, %v335_v2   ;;  %1152 = vset.pattern.permute.xlu1 (!%p250_p9), %v1249_v1  ;;  %v587_v5 = vld [vmem:[%s1545_s4] sm:$0xff] (!%p250_p9)  ;;  %v589_v8 = vld [vmem:[%s1545_s4 + $0x10] sm:$0xff] (!%p250_p9)  ;;  %v742_v21 = vld [vmem:[%s1547_s6 + $0x8] sm:$0x1] (!%p250_p9)  ;;  %s282_s22 = sand.u32 (!%p250_p9), 1, %s1239_s25   ;;  %s1012_s9 = sshll.u32 (!%p250_p9), %s1316_s28, 8 }
  0x10   : > { %350 = vperm.xlu1 (!%p250_p9), %1152, %v337_v3   ;;  %v741_v18 = vld [vmem:[%s1547_s6] sm:$0xff] (!%p250_p9)  ;;  %v333_v59 = vld [vmem:[%s1542_s1 + $0x8] sm:$0xff] (!%p250_p9)  ;;  %v334_v60 = vld [vmem:[%s1542_s1 + $0x10] sm:$0xff] (!%p250_p9)  ;;  %678 = vmatprep.mubr.f32.mxu1 (!%p250_p9), %v1250_v61  ;;  %s948_s23 = sshll.u32 (!%p250_p9), %s282_s22, 5  ;;  %s1500_s28 = scalar_lea.sflag (!%p250_p9), [#allocation3], %s282_s22 }
  0x11   : > { %s1251_s17 = smov (!%p250_p9), [#allocation2]  }
  0x12   : > { %s1189_s18 = sshll.u32 (!%p250_p9), %s1251_s17, 4  ;;  %s1190_s18 = int_to_ptr.vmem [resolvable:$false] %s1189_s18 }
  0x13   : > { %345 = vperm.xlu0 (!%p250_p9), %1151, %v336_v4   ;;  %s1191_s19 = scalar_lea.vmem (!%p250_p9), %s1190_s18, 1024 }
  0x14   : > { %592 = vperm.xlu1 (!%p250_p9), %1152, %v587_v5  }
  0x15   : > { %s1558_s13 = smov (!%p290_p10, %s949_s13), 124 }
  0x16   : > { %s950_s29 = sshll.u32 %s1558_s13, 3  ;;  %s1496_s13 = scalar_lea.hbm %s1548_s7, %s1012_s9 }
  0x17   : > { %s1366_s14 = scalar_lea.vmem %s1541_s0, %s950_s29  ;;  %597 = vperm.xlu0 %1151, %v588_v7   ;;  %s284_s29 = scalar_lea.vmem [#allocation2], %s948_s23 }
  0x18   : > { %v316_v9 = vld [vmem:[%s1366_s14 + $0x80] sm:$0xff]  ;;  %v317_v10 = vld [vmem:[%s1366_s14 + $0x88] sm:$0xff]  ;;  %v318_v14 = vld [vmem:[%s1366_s14 + $0x90] sm:$0xff]  ;;  %602 = vperm.xlu1 %1152, %v589_v8   ;;  %s882_s8 = sshll.u32 %s284_s29, 4  ;;  %s1491_s8 = int_to_ptr.vmem [resolvable:$true] %s882_s8 }
  0x19   : > { %v300_v11 = vld [vmem:[%s1366_s14] sm:$0xff]  ;;  %v1051_v12 = vpack.c.bf16 %v317_v10, %v316_v9  ;;  %v301_v13 = vld [vmem:[%s1366_s14 + $0x8] sm:$0xff]  ;;  %v319_v15 = vld [vmem:[%s1366_s14 + $0x98] sm:$0xff]  ;;  %s1185_s16 = scalar_lea.vmem %s1491_s8, 512  ;;  %p1192_p0 = scmp.lt.s32.totalorder %s1491_s8, %s1190_s18 }
  0x1a   : > { %v1054_v16 = vpack.c.bf16 %v301_v13, %v300_v11  ;;  %v1057_v17 = vpack.c.bf16 %v319_v15, %v318_v14  ;;  %v302_v19 = vld [vmem:[%s1366_s14 + $0x10] sm:$0xff]  ;;  %v303_v20 = vld [vmem:[%s1366_s14 + $0x18] sm:$0xff]  ;;  %v320_v22 = vld [vmem:[%s1366_s14 + $0xa0] sm:$0xff]  ;;  %p1186_p11 = scmp.ne.s32.totalorder %s1491_s8, %s1185_s16  ;;  %p1193_p1 = scmp.lt.s32.totalorder %s1191_s19, %s1185_s16 }
  0x1b   : > { %1053 = vmatprep.subr.msk.bf16.mxu0 %vm1370_vm1, %v1051_v12  ;;  %v321_v23 = vld [vmem:[%s1366_s14 + $0xa8] sm:$0xff]  ;;  %745 = vperm.xlu0 %1151, %v741_v18   ;;  %v1060_v24 = vpack.c.bf16 %v303_v20, %v302_v19  ;;  %v304_v26 = vld [vmem:[%s1366_s14 + $0x20] sm:$0xff]  ;;  %v322_v28 = vld [vmem:[%s1366_s14 + $0xb0] sm:$0xff] }
  0x1c   : > { %1056 = vmatpush3.bf16.xpose.msk.msra.mxu0 %vm1370_vm1, %v1054_v16  ;;  %750 = vperm.xlu1 %1152, %v742_v21   ;;  %v1063_v25 = vpack.c.bf16 %v321_v23, %v320_v22  ;;  %v305_v27 = vld [vmem:[%s1366_s14 + $0x28] sm:$0xff]  ;;  %v323_v29 = vld [vmem:[%s1366_s14 + $0xb8] sm:$0xff]  ;;  %v306_v32 = vld [vmem:[%s1366_s14 + $0x30] sm:$0xff]  ;;  %p1187_p12 = pnand %p1186_p11, %p1333_p5  ;;  %p1194_p2 = por %p1193_p1, %p1192_p0 }
  0x1d   : > { %1059 = vmatprep.subr.msk.bf16.mxu0 %vm1370_vm1, %v1057_v17  ;;  %v1066_v30 = vpack.c.bf16 %v305_v27, %v304_v26  ;;  %v1069_v31 = vpack.c.bf16 %v323_v29, %v322_v28  ;;  %v307_v33 = vld [vmem:[%s1366_s14 + $0x38] sm:$0xff]  ;;  %v324_v34 = vld [vmem:[%s1366_s14 + $0xc0] sm:$0xff]  ;;  %v325_v35 = vld [vmem:[%s1366_s14 + $0xc8] sm:$0xff] }
  0x1e   : > { %v1072_v36 = vpack.c.bf16 %v307_v33, %v306_v32  ;;  %v1075_v37 = vpack.c.bf16 %v325_v35, %v324_v34  ;;  %v308_v38 = vld [vmem:[%s1366_s14 + $0x40] sm:$0xff]  ;;  %v309_v39 = vld [vmem:[%s1366_s14 + $0x48] sm:$0xff]  ;;  %v326_v40 = vld [vmem:[%s1366_s14 + $0xd0] sm:$0xff]  ;;  %p1188_p13 = pneg %p1187_p12 }
  0x1f   : > { %v327_v41 = vld [vmem:[%s1366_s14 + $0xd8] sm:$0xff]  ;;  %v1078_v42 = vpack.c.bf16 %v309_v39, %v308_v38  ;;  %v310_v44 = vld [vmem:[%s1366_s14 + $0x50] sm:$0xff]  ;;  %v328_v46 = vld [vmem:[%s1366_s14 + $0xe0] sm:$0xff] }
  0x20   : > { %v1081_v43 = vpack.c.bf16 %v327_v41, %v326_v40  ;;  %v311_v45 = vld [vmem:[%s1366_s14 + $0x58] sm:$0xff]  ;;  %v329_v47 = vld [vmem:[%s1366_s14 + $0xe8] sm:$0xff]  ;;  %v312_v50 = vld [vmem:[%s1366_s14 + $0x60] sm:$0xff]  ;;  %p1195_p3 = pnand %p1194_p2, %p1188_p13 }
  0x21   : > { %v1084_v48 = vpack.c.bf16 %v311_v45, %v310_v44  ;;  %v1087_v49 = vpack.c.bf16 %v329_v47, %v328_v46  ;;  %v313_v51 = vld [vmem:[%s1366_s14 + $0x68] sm:$0xff]  ;;  %v330_v52 = vld [vmem:[%s1366_s14 + $0xf0] sm:$0xff]  ;;  %v331_v53 = vld [vmem:[%s1366_s14 + $0xf8] sm:$0xff] }
  0x22   : > { %v1090_v54 = vpack.c.bf16 %v313_v51, %v312_v50  ;;  %v1093_v55 = vpack.c.bf16 %v331_v53, %v330_v52  ;;  %v314_v56 = vld [vmem:[%s1366_s14 + $0x70] sm:$0xff]  ;;  %v315_v57 = vld [vmem:[%s1366_s14 + $0x78] sm:$0xff]  ;;  %v584_v51 = vld [vmem:[%s1544_s3] sm:$0xff] }
  0x23   : > { %v1096_v58 = vpack.c.bf16 %v315_v57, %v314_v56  ;;  %v585_v52 = vld [vmem:[%s1544_s3 + $0x8] sm:$0xff]  ;;  %v586_v53 = vld [vmem:[%s1544_s3 + $0x10] sm:$0xff] }
  0x24   : > { %1062 = vmatpush3.bf16.xpose.msk.msra.mxu0 %vm1370_vm1, %v1060_v24 }
  0x25   : > { %1065 = vmatprep.subr.msk.bf16.mxu0 %vm1370_vm1, %v1063_v25 }
  0x2c   : > { %1068 = vmatpush3.bf16.xpose.msk.msra.mxu0 %vm1370_vm1, %v1066_v30 }
  0x2d   : > { %1071 = vmatprep.subr.msk.bf16.mxu0 %vm1370_vm1, %v1069_v31 }
  0x34   : > { %1074 = vmatpush3.bf16.xpose.msk.msra.mxu0 %vm1370_vm1, %v1072_v36 }
  0x35   : > { %1077 = vmatprep.subr.msk.bf16.mxu0 %vm1370_vm1, %v1075_v37 }
  0x3c   : > { %1080 = vmatpush3.bf16.xpose.msk.msra.mxu0 %vm1370_vm1, %v1078_v42 }
  0x3d   : > { %1083 = vmatprep.subr.msk.bf16.mxu0 %vm1370_vm1, %v1081_v43 }
  0x44   : > { %1086 = vmatpush3.bf16.xpose.msk.msra.mxu0 %vm1370_vm1, %v1084_v48 }
  0x45   : > { %1089 = vmatprep.subr.msk.bf16.mxu0 %vm1370_vm1, %v1087_v49 }
  0x4c   : > { %1092 = vmatpush3.bf16.xpose.msk.msra.mxu0 %vm1370_vm1, %v1090_v54 }
  0x4d   : > { %1095 = vmatprep.subr.msk.bf16.mxu0 %vm1370_vm1, %v1093_v55 }
  0x54   : > { %1098 = vmatpush3.bf16.xpose.msk.msra.mxu0 %vm1370_vm1, %v1096_v58 }
  0x5b   : > { %1046 = vmatmul.mubr.msk.f32.vlgmr.msra.gmra.mrb[0].mxu0 %vm353_vm0, %v1347_v0 }
  0x5c   : > { %1047 = vmatprep.mubr.msk.f32.mxu0 %vm353_vm0, %v333_v59 }
  0x5f   : > { %1048 = vmatmul.mubr.msk.f32.gmra.mrb[2].mxu0 %vm353_vm0, %v333_v59 }
  0x60   : > { %1049 = vmatprep.mubr.msk.f32.mxu0 %vm353_vm0, %v334_v60 }
  0x63   : > { %1050 = vmatmul.mubr.msk.f32.gmra.mrb[4].mxu0 %vm353_vm0, %v334_v60 }
  0x8e   : > { %v341_v62 = vpop.permute.xlu0 %340 }
  0x8f   : > { %v351_v11 = vpop.permute.xlu1 %350 }
  0x92   : > { %v346_v4 = vpop.permute.xlu0 %345 }
  0x93   : > { %v593_v54 = vpop.permute.xlu1 %592 }
  0x96   : > { %v598_v60 = vpop.permute.xlu0 %597 }
 0x12e   : > { %v525_v63 = vpop.f32.mrb[0].mxu0 }
 0x12f   : > { %v526_v1 = vadd.f32 %v525_v63, %v341_v62  ;;  %v527_v2 = vpop.f32.mrb[1].mxu0 }
 0x130   : > { %v528_v0 = vadd.f32 %v527_v2, %v341_v62 }
 0x131   : > { %v548_v3 = vmul.f32 1.442695, %v526_v1  ;;  %vm542_vm2 = vcmp.gt.f32.partialorder %v526_v1, 0.0 }
 0x132   : > { %v550_v5 = vmul.f32 1.442695, %v528_v0  ;;  %v531_v6 = vpop.f32.mrb[2].mxu0  ;;  %vm543_vm3 = vcmp.gt.f32.partialorder %v528_v0, 0.0 }
 0x133   : > { %1153 = vpow2.f32 %v548_v3  ;;  %v532_v7 = vadd.f32 %v531_v6, %v346_v4  ;;  %v533_v8 = vpop.f32.mrb[3].mxu0 }
 0x134   : > { %1155 = vpow2.f32 %v550_v5  ;;  %v534_v9 = vadd.f32 %v533_v8, %v346_v4  ;;  %v603_v4 = vpop.permute.xlu1 %602 }
 0x135   : > { %v552_v10 = vmul.f32 1.442695, %v532_v7  ;;  %vm544_vm4 = vcmp.gt.f32.partialorder %v532_v7, 0.0 }
 0x136   : > { %v554_v12 = vmul.f32 1.442695, %v534_v9  ;;  %v537_v13 = vpop.f32.mrb[4].mxu0  ;;  %vm545_vm5 = vcmp.gt.f32.partialorder %v534_v9, 0.0 }
 0x137   : > { %1157 = vpow2.f32 %v552_v10  ;;  %v538_v14 = vadd.f32 %v537_v13, %v351_v11  ;;  %v539_v15 = vpop.f32.mrb[5].mxu0 }
 0x138   : > { %1159 = vpow2.f32 %v554_v12  ;;  %v540_v16 = vadd.f32 %v539_v15, %v351_v11 }
 0x139   : > { %v556_v17 = vmul.f32 1.442695, %v538_v14  ;;  %vm546_vm7 = vcmp.gt.f32.partialorder %v538_v14, 0.0 }
 0x13a   : > { %v558_v18 = vmul.f32 1.442695, %v540_v16  ;;  %vm547_vm6 = vcmp.gt.f32.partialorder %v540_v16, 0.0 }
 0x13b   : > { %1161 = vpow2.f32 %v556_v17 }
 0x13c   : > { %1163 = vpow2.f32 %v558_v18 }
 0x13d   : > { %v1154_v19 = vpop.eup %1153 }
 0x13e   : > { %v1156_v20 = vpop.eup %1155  ;;  %v986_v21 = vadd.f32 -1.0, %v1154_v19 }
 0x13f   : > { %v987_v22 = vadd.f32 -1.0, %v1156_v20 }
 0x140   : > { %v566_v23 = vmul.f32 1.6732632, %v986_v21 }
 0x141   : > { %v1158_v24 = vpop.eup %1157  ;;  %v567_v25 = vmul.f32 1.6732632, %v987_v22 }
 0x142   : > { %v1160_v26 = vpop.eup %1159  ;;  %v988_v27 = vadd.f32 -1.0, %v1158_v24  ;;  %v572_v30 = vsel %vm542_vm2, %v526_v1, %v566_v23 }
 0x143   : > { %v989_v28 = vadd.f32 -1.0, %v1160_v26  ;;  %v573_v33 = vsel %vm543_vm3, %v528_v0, %v567_v25  ;;  %v578_v39 = vmul.f32 1.050701, %v572_v30 }
 0x144   : > { %v568_v29 = vmul.f32 1.6732632, %v988_v27  ;;  %v579_v41 = vmul.f32 1.050701, %v573_v33 }
 0x145   : > { %v1162_v31 = vpop.eup %1161  ;;  %v569_v32 = vmul.f32 1.6732632, %v989_v28 }
 0x146   : > { %v1164_v34 = vpop.eup %1163  ;;  %v990_v35 = vadd.f32 -1.0, %v1162_v31  ;;  %v574_v36 = vsel %vm544_vm4, %v532_v7, %v568_v29 }
 0x147   : > { %v991_v37 = vadd.f32 -1.0, %v1164_v34  ;;  %v575_v38 = vsel %vm545_vm5, %v534_v9, %v569_v32  ;;  %v580_v40 = vmul.f32 1.050701, %v574_v36 }
 0x148   : > { %v581_v42 = vmul.f32 1.050701, %v575_v38  ;;  %v570_v43 = vmul.f32 1.6732632, %v990_v35 }
 0x149   : > { %v1101_v44 = vpack.c.bf16 %v580_v40, %v578_v39  ;;  %v571_v45 = vmul.f32 1.6732632, %v991_v37 }
 0x14a   : > { %v1099_v46 = vpack.c.bf16 %v581_v42, %v579_v41  ;;  %v576_v49 = vsel %vm546_vm7, %v538_v14, %v570_v43 }
 0x14b   : > { %v577_v47 = vsel %vm547_vm6, %v540_v16, %v571_v45  ;;  %v582_v50 = vmul.f32 1.050701, %v576_v49  ;;  %v740_v45 = vld [vmem:[%s1546_s5 + $0x8] sm:$0x1] }
 0x14c   : > { %1100 = vmatprep.subr.bf16.mxu1 %v1099_v46  ;;  %v583_v48 = vmul.f32 1.050701, %v577_v47  ;;  %v746_v46 = vpop.permute.xlu0 %745 }
 0x14d   : > { %1102 = vmatpush1.bf16.msra.mxu1 %v1101_v44  ;;  %v739_v44 = vld [vmem:[%s1546_s5] sm:$0xff] }
 0x14e   : > { %618 = vmatprep.subr.mxu1 %v583_v48 }
 0x151   : > { %619 = vmatpush1.msra.mxu1 %v582_v50 }
 0x152   : > { %992 = vmatmul.mubr.msk.f32.vlgmr.msra.gmra.mrb[0].mxu1 %vm353_vm0, %v584_v51 }
 0x153   : > { %684 = vmatprep.mubr.f32.mxu1 %v1250_v61 }
 0x156   : > { %993 = vmatmul.mubr.msk.f32.gmra.mrb[2].mxu1 %vm353_vm0, %v585_v52  ;;  %v751_v52 = vpop.permute.xlu1 %750 }
 0x157   : > { %690 = vmatprep.mubr.f32.mxu1 %v1250_v61 }
 0x15a   : > { %994 = vmatmul.mubr.msk.f32.gmra.mrb[4].mxu1 %vm353_vm0, %v586_v53 }
 0x15b   : > { %823 = vmatprep.mubr.f32.mxu1 %v1250_v61 }
 0x225   : > { %v680_v55 = vpop.f32.mrb[0].mxu1 }
 0x226   : > { %v681_v56 = vadd.f32 %v680_v55, %v593_v54  ;;  %v682_v57 = vpop.f32.mrb[1].mxu1 }
 0x227   : > { %v683_v58 = vadd.f32 %v682_v57, %v593_v54 }
 0x228   : > { %v703_v59 = vmul.f32 1.442695, %v681_v56  ;;  %vm697_vm8 = vcmp.gt.f32.partialorder %v681_v56, 0.0 }
 0x229   : > { %v705_v62 = vmul.f32 1.442695, %v683_v58  ;;  %v686_v63 = vpop.f32.mrb[2].mxu1  ;;  %vm698_vm9 = vcmp.gt.f32.partialorder %v683_v58, 0.0 }
 0x22a   : > { %1165 = vpow2.f32 %v703_v59  ;;  %v687_v1 = vadd.f32 %v686_v63, %v598_v60  ;;  %v688_v2 = vpop.f32.mrb[3].mxu1 }
 0x22b   : > { %1167 = vpow2.f32 %v705_v62  ;;  %v689_v0 = vadd.f32 %v688_v2, %v598_v60 }
 0x22c   : > { %v707_v3 = vmul.f32 1.442695, %v687_v1  ;;  %vm699_vm10 = vcmp.gt.f32.partialorder %v687_v1, 0.0 }
 0x22d   : > { %v709_v5 = vmul.f32 1.442695, %v689_v0  ;;  %v692_v6 = vpop.f32.mrb[4].mxu1  ;;  %vm700_vm11 = vcmp.gt.f32.partialorder %v689_v0, 0.0 }
 0x22e   : > { %1169 = vpow2.f32 %v707_v3  ;;  %v693_v7 = vadd.f32 %v692_v6, %v603_v4  ;;  %v694_v8 = vpop.f32.mrb[5].mxu1 }
 0x22f   : > { %1171 = vpow2.f32 %v709_v5  ;;  %v695_v9 = vadd.f32 %v694_v8, %v603_v4 }
 0x230   : > { %v711_v10 = vmul.f32 1.442695, %v693_v7  ;;  %vm701_vm13 = vcmp.gt.f32.partialorder %v693_v7, 0.0 }
 0x231   : > { %v713_v11 = vmul.f32 1.442695, %v695_v9  ;;  %vm702_vm12 = vcmp.gt.f32.partialorder %v695_v9, 0.0 }
 0x232   : > { %1173 = vpow2.f32 %v711_v10 }
 0x233   : > { %1175 = vpow2.f32 %v713_v11 }
 0x234   : > { %v1166_v12 = vpop.eup %1165 }
 0x235   : > { %v1168_v13 = vpop.eup %1167  ;;  %v995_v14 = vadd.f32 -1.0, %v1166_v12 }
 0x236   : > { %v996_v15 = vadd.f32 -1.0, %v1168_v13 }
 0x237   : > { %v721_v16 = vmul.f32 1.6732632, %v995_v14 }
 0x238   : > { %v1170_v17 = vpop.eup %1169  ;;  %v722_v18 = vmul.f32 1.6732632, %v996_v15 }
 0x239   : > { %v1172_v19 = vpop.eup %1171  ;;  %v997_v20 = vadd.f32 -1.0, %v1170_v17  ;;  %v727_v22 = vsel %vm697_vm8, %v681_v56, %v721_v16 }
 0x23a   : > { %v998_v21 = vadd.f32 -1.0, %v1172_v19  ;;  %v728_v25 = vsel %vm698_vm9, %v683_v58, %v722_v18  ;;  %v733_v30 = vmul.f32 1.050701, %v727_v22 }
 0x23b   : > { %v723_v23 = vmul.f32 1.6732632, %v997_v20  ;;  %v734_v34 = vmul.f32 1.050701, %v728_v25 }
 0x23c   : > { %v1174_v24 = vpop.eup %1173  ;;  %v724_v26 = vmul.f32 1.6732632, %v998_v21 }
 0x23d   : > { %v1176_v27 = vpop.eup %1175  ;;  %v729_v28 = vsel %vm699_vm10, %v687_v1, %v723_v23  ;;  %v999_v29 = vadd.f32 -1.0, %v1174_v24 }
 0x23e   : > { %v735_v31 = vmul.f32 1.050701, %v729_v28  ;;  %v730_v32 = vsel %vm700_vm11, %v689_v0, %v724_v26  ;;  %v1000_v33 = vadd.f32 -1.0, %v1176_v27 }
 0x23f   : > { %v736_v35 = vmul.f32 1.050701, %v730_v32  ;;  %v725_v36 = vmul.f32 1.6732632, %v999_v29 }
 0x240   : > { %v1105_v37 = vpack.c.bf16 %v735_v31, %v733_v30  ;;  %v726_v38 = vmul.f32 1.6732632, %v1000_v33 }
 0x241   : > { %v1103_v39 = vpack.c.bf16 %v736_v35, %v734_v34  ;;  %v731_v41 = vsel %vm701_vm13, %v693_v7, %v725_v36 }
 0x242   : > { %v732_v40 = vsel %vm702_vm12, %v695_v9, %v726_v38  ;;  %v737_v43 = vmul.f32 1.050701, %v731_v41 }
 0x243   : > { %1104 = vmatprep.subr.bf16.mxu1 %v1103_v39  ;;  %v738_v42 = vmul.f32 1.050701, %v732_v40 }
 0x244   : > { %1106 = vmatpush1.bf16.msra.mxu1 %v1105_v37 }
 0x245   : > { %763 = vmatprep.subr.mxu1 %v738_v42 }
 0x248   : > { %764 = vmatpush1.msra.mxu1 %v737_v43 }
 0x249   : > { %1001 = vmatmul.mubr.msk.f32.vlgmr.msra.gmra.mrb[6].mxu1 %vm353_vm0, %v739_v44 }
 0x24a   : > { %829 = vmatprep.mubr.f32.mxu1 %v1250_v61 }
 0x24d   : > { %1002 = vmatmul.mubr.msk.f32.gmra.mrb[8].mxu1 %vm353_vm0, %v740_v45 }
 0x31c   : > { %v825_v47 = vpop.f32.mrb[6].mxu1 }
 0x31d   : > { %v826_v48 = vadd.f32 %v825_v47, %v746_v46  ;;  %v827_v49 = vpop.f32.mrb[7].mxu1 }
 0x31e   : > { %v828_v50 = vadd.f32 %v827_v49, %v746_v46 }
 0x31f   : > { %v840_v51 = vmul.f32 1.442695, %v826_v48  ;;  %vm836_vm14 = vcmp.gt.f32.partialorder %v826_v48, 0.0 }
 0x320   : > { %v842_v53 = vmul.f32 1.442695, %v828_v50  ;;  %v831_v54 = vpop.f32.mrb[8].mxu1  ;;  %vm837_vm15 = vcmp.gt.f32.partialorder %v828_v50, 0.0 }
 0x321   : > { %1177 = vpow2.f32 %v840_v51  ;;  %v832_v55 = vadd.f32 %v831_v54, %v751_v52  ;;  %v833_v61 = vpop.f32.mrb[9].mxu1 }
 0x322   : > { %1179 = vpow2.f32 %v842_v53  ;;  %v834_v56 = vadd.f32 %v833_v61, %v751_v52 }
 0x323   : > { %v844_v57 = vmul.f32 1.442695, %v832_v55  ;;  %vm838_vm0 = vcmp.gt.f32.partialorder %v832_v55, 0.0 }
 0x324   : > { %v846_v58 = vmul.f32 1.442695, %v834_v56  ;;  %vm839_vm1 = vcmp.gt.f32.partialorder %v834_v56, 0.0 }
 0x325   : > { %1181 = vpow2.f32 %v844_v57 }
 0x326   : > { %1183 = vpow2.f32 %v846_v58 }
 0x32b   : > { %v1178_v59 = vpop.eup %1177 }
 0x32c   : > { %v1180_v60 = vpop.eup %1179  ;;  %v1003_v62 = vadd.f32 -1.0, %v1178_v59 }
 0x32d   : > { %v1004_v63 = vadd.f32 -1.0, %v1180_v60 }
 0x32e   : > { %v852_v1 = vmul.f32 1.6732632, %v1003_v62 }
 0x32f   : > { %v1182_v2 = vpop.eup %1181  ;;  %v853_v0 = vmul.f32 1.6732632, %v1004_v63 }
 0x330   : > { %v1184_v3 = vpop.eup %1183  ;;  %v856_v4 = vsel %vm836_vm14, %v826_v48, %v852_v1  ;;  %v1005_v5 = vadd.f32 -1.0, %v1182_v2 }
 0x331   : > { %v860_v6 = vmul.f32 1.050701, %v856_v4  ;;  %v857_v7 = vsel %vm837_vm15, %v828_v50, %v853_v0  ;;  %v1006_v8 = vadd.f32 -1.0, %v1184_v3 }
 0x332   : > { %v861_v9 = vmul.f32 1.050701, %v857_v7  ;;  %v854_v10 = vmul.f32 1.6732632, %v1005_v5 }
 0x333   : > { %864 = vst [vmem:[%s284_s29] sm:$0xff] %v860_v6  ;;  %v855_v11 = vmul.f32 1.6732632, %v1006_v8 }
 0x334   : > { %865 = vst [vmem:[%s284_s29 + $0x8] sm:$0xff] %v861_v9  ;;  %v858_v12 = vsel %vm838_vm0, %v832_v55, %v854_v10 }
 0x335   : > { %v862_v13 = vmul.f32 1.050701, %v858_v12  ;;  %v859_v14 = vsel %vm839_vm1, %v834_v56, %v855_v11 }
 0x336   : > { %v863_v15 = vmul.f32 1.050701, %v859_v14 }
 0x337   : > { %866 = vst [vmem:[%s284_s29 + $0x10] sm:$0x1] %v862_v13 }
 0x338   : > { %867 = vst [vmem:[%s284_s29 + $0x18] sm:$0x1] %v863_v15 }
 0x339   : > { %1198 = shalt.err (!%p1195_p3)
}
 0x33a   : > { %s1199_s20 = scalar_lea.hbm %s1496_s13, 512  ;;  %s1203_s23 = scalar_lea.hbm %s1548_s7, 2048 }
 0x33b   : > { %p1200_p4 = scmp.ne.s32.totalorder %s1496_s13, %s1199_s20  ;;  %p1204_p9 = scmp.lt.u32.totalorder %s1496_s13, %s1548_s7 }
 0x33c   : > { %p1205_p10 = scmp.lt.u32.totalorder %s1203_s23, %s1199_s20  ;;  %p1207_p12 = scmp.lt.u32.totalorder %s1199_s20, %s1496_s13 }
 0x33d   : > { %p1201_p7 = pnand %p1200_p4, %p1333_p5 }
 0x33e   : > { %p1206_p11 = por %p1205_p10, %p1204_p9 }
 0x33f   : > { %p1202_p8 = pneg %p1201_p7 }
 0x340   : > { %p1208_p13 = por %p1207_p12, %p1206_p11 }
 0x342   : > { %p1209_p0 = pnand %p1208_p13, %p1202_p8 }
 0x344   : > { %1212 = shalt.err (!%p1209_p0)
}
 0x345   : > { %s1252_s14 = smov 256   ;;  %s1253_s15 = smov 1024  }
 0x346   : > { %s1254_s16 = smov 16  }
 0x347   : > { %1107 = dma.vmem_to_hbm [thread:$0]  (%p1333_p5), %s1491_s8, 512, %s1496_s13, %s1500_s28, %s1252_s14, %s1253_s15, %s1254_s16  }
 0x348 PF: > { %p1113_p1 = scmp.ge.s32.totalorder %s1247_s27, 2  ;;  %s897_s17 = sand.u32 1, %s1235_s24  }
 0x349   : > { %s898_s18 = scalar_lea.sflag [#allocation3], %s897_s17 }
 0x34a   : > { %p1110_p2 = pnand %p1113_p1, %p1337_p6 }
 0x34c   : > { %1230 = dma.done.wait (!%p1110_p2), %s898_s18, 512  }
 0x34d   : > { %1232 = vsyncadd (!%p1110_p2), %s898_s18, 4294966784  ;;  %p17_p3 = scmp.ge.s32.totalorder %s1320_s30, 6   ;;  %s1553_s24 = smov %s1239_s25 }
 0x34e   : > { %s1554_s25 = smov %s1243_s26  ;;  %s1555_s26 = smov %s1331_s10 }
 0x34f   : > { %s1556_s27 = smov %s1320_s30  ;;  %19 = sbr.rel (!%p17_p3) target bundleno = 3 (0x3), region = 83 }
 0x356   :  { %903 = vsyncpa [#allocation3], 1 }
 0x357   :  { %905 = vsyncpa [#allocation3 + $0x1], 1 }

</bundles_post_ra>
